<compile_context>
chip_gen: v7x
topology: tpu7x:2x2x1
jax: 0.10.0
libtpu: 0.0.40
codegen_flags: <defaults>
</compile_context>

<pallas_src>
import jax
import jax.numpy as jnp
from jax.experimental import pallas as pl
from jax.experimental.pallas import tpu as pltpu


def _normalize_kernel(x_ref, ab_ref, o_ref):
    # x_ref:  (TR, TL)  rows = batch*channel block, lanes = spatial block
    # ab_ref: (TR, 2)   column 0 = per-row scale (1/std), column 1 = shift (-mean/std)
    # o_ref:  (TR, TL)
    a = ab_ref[:, 0:1]
    b = ab_ref[:, 1:2]
    o_ref[...] = x_ref[...] * a + b


def _pick_tile(dim, unit, cap):
    """Tile size for one axis.

    dim <= cap : full extent (always a legal block, and bounded by cap).
    dim >  cap : fixed cap-sized block (cap is a multiple of `unit`); the grid
                 uses pl.cdiv so the ragged edge block is masked by Pallas.
    """
    if dim <= cap:
        return dim
    return cap


def normalized_model(x, mean, std):
    """x: (N, C, H, W) float32 (NCHW, like PyTorch); mean, std: (C,) float32."""
    N, C, H, W = x.shape
    R, L = N * C, H * W

    # Exact affine rewrite of (x - mean) / std  ->  x * a + b.
    a = (1.0 / std).astype(jnp.float32)
    b = (-mean / std).astype(jnp.float32)

    # Present data to the kernel in the documented (R, L) layout.
    x2d = x.reshape(R, L)
    ab = jnp.stack([a, b], axis=-1).astype(x.dtype)      # (C, 2)
    ab_rows = jnp.tile(ab, (N, 1))                        # (R, 2)

    # Tile caps: row tile 256 (multiple of 8), lane tile 2048 (multiple of 128)
    # -> x/out blocks up to 2 MiB each; double-buffered total ~8.3 MiB.
    TR = _pick_tile(R, 8, 256)
    TL = _pick_tile(L, 128, 2048)
    grid = (pl.cdiv(R, TR), pl.cdiv(L, TL))

    out2d = pl.pallas_call(
        _normalize_kernel,
        out_shape=jax.ShapeDtypeStruct((R, L), x.dtype),
        grid_spec=pltpu.PrefetchScalarGridSpec(
            num_scalar_prefetch=0,
            grid=grid,
            in_specs=[
                pl.BlockSpec((TR, TL), lambda i, j: (i, j)),
                pl.BlockSpec((TR, 2), lambda i, j: (i, 0)),
            ],
            out_specs=pl.BlockSpec((TR, TL), lambda i, j: (i, j)),
        ),
        compiler_params=pltpu.CompilerParams(
            # Elementwise: both axes independent -> shard across v7x's 2 TCs.
            dimension_semantics=("parallel", "parallel"),
        ),
    )(x2d, ab_rows)

    normalized = out2d.reshape(N, C, H, W)

    # Wrapped model application (identity stand-in; see TODO above).
    return normalized


if __name__ == "__main__":
    key = jax.random.PRNGKey(0)
    # Small CIFAR-like shapes consistent with the module (3 channels).
    N, C, H, W = 2, 3, 32, 32
    x = jax.random.uniform(key, (N, C, H, W), dtype=jnp.float32)

    # Deterministic normalization constants (CIFAR-style).
    mean = jnp.array([0.4914, 0.4822, 0.4465], dtype=jnp.float32)
    std = jnp.array([0.2471, 0.2435, 0.2616], dtype=jnp.float32)

    out = normalized_model(x, mean, std)
    out = jax.block_until_ready(out)

    # Sanity check against plain-JAX reference of the same semantics.
    ref = (x - mean.reshape(1, C, 1, 1)) / std.reshape(1, C, 1, 1)
    assert out.shape == (N, C, H, W)
    assert jnp.allclose(out, ref, atol=1e-5, rtol=1e-5)

    print("KERNEL_OK")
</pallas_src>

<mosaic_0001>
module attributes {stable_mosaic.version = 11 : i64} {
  func.func @_normalize_kernel(%arg0: i32, %arg1: i32, %arg2: memref<6x1024xf32, #tpu.memory_space<vmem>>, %arg3: memref<6x2xf32, #tpu.memory_space<vmem>>, %arg4: memref<6x1024xf32, #tpu.memory_space<vmem>>) attributes {dimension_semantics = [#tpu.dimension_semantics<parallel>, #tpu.dimension_semantics<parallel>], iteration_bounds = array<i64: 1, 1>, scalar_prefetch = 0 : i64, scratch_operands = 0 : i64, tpu.core_type = #tpu.core_type<tc>, window_params = [{transform_indices = @transform_0, window_bounds = array<i64: 6, 1024>}, {transform_indices = @transform_1, window_bounds = array<i64: 6, 2>}, {transform_indices = @transform_2, window_bounds = array<i64: 6, 1024>}]} {
    %c0 = arith.constant 0 : index
    %c0_0 = arith.constant 0 : index
    %0 = vector.load %arg3[%c0, %c0_0] : memref<6x2xf32, #tpu.memory_space<vmem>>, vector<6x1xf32>
    %c0_1 = arith.constant 0 : index
    %c1 = arith.constant 1 : index
    %1 = vector.load %arg3[%c0_1, %c1] : memref<6x2xf32, #tpu.memory_space<vmem>>, vector<6x1xf32>
    %c0_2 = arith.constant 0 : index
    %c0_3 = arith.constant 0 : index
    %2 = vector.load %arg2[%c0_2, %c0_3] : memref<6x1024xf32, #tpu.memory_space<vmem>>, vector<6x1024xf32>
    %3 = vector.broadcast %0 : vector<6x1xf32> to vector<6x1024xf32>
    %4 = arith.mulf %2, %3 : vector<6x1024xf32>
    %5 = vector.broadcast %1 : vector<6x1xf32> to vector<6x1024xf32>
    %6 = arith.addf %4, %5 : vector<6x1024xf32>
    %c0_4 = arith.constant 0 : index
    %c0_5 = arith.constant 0 : index
    %7 = vector.load %arg4[%c0_4, %c0_5] : memref<6x1024xf32, #tpu.memory_space<vmem>>, vector<6x1024xf32>
    tpu.vector_store %arg4[%c0_4, %c0_5], %6 {strides = array<i32>} : memref<6x1024xf32, #tpu.memory_space<vmem>>, vector<6x1024xf32>,
    return
  }
  func.func @transform_0(%arg0: i32, %arg1: i32) -> (i32, i32) {
    %c0_i32 = arith.constant 0 : i32
    return %arg0, %arg1 : i32, i32
  }
  func.func @transform_1(%arg0: i32, %arg1: i32) -> (i32, i32) {
    %c0_i32 = arith.constant 0 : i32
    %c0_i32_0 = arith.constant 0 : i32
    return %arg0, %c0_i32 : i32, i32
  }
  func.func @transform_2(%arg0: i32, %arg1: i32) -> (i32, i32) {
    %c0_i32 = arith.constant 0 : i32
    return %arg0, %arg1 : i32, i32
  }
}

</mosaic_0001>

<bundles_post_ra>
// kernel: tpu_custom_call.1
= control target key start
LH: loop header
LB: loop body
LE: loop exit
PB: predicated region body
PF: predicated region fallthrough
CT: control target
= control target key end

     0   :  { %7 = vsyncpa [#allocation3], 0  ;;  %s181_s0 = inlined_call_operand.hbm [shape: f32[6,1024], index: 0, kind: input, shape index: {}]   ;;  %s182_s1 = inlined_call_operand.vmem [shape: f32[6,2], index: 1, kind: input, shape index: {}]   ;;  %s183_s2 = inlined_call_operand.hbm [shape: f32[6,1024], index: 2, kind: output, shape index: {}]  }
   0x1   :  { %8 = vsyncpa [#allocation4], 0  ;;  %s135_s9 = smov [#allocation2]   ;;  %s87_s13 = scalar_lea.hbm %s181_s0, 1024 }
   0x2   :  { %s15_s10 = sshll.u32 %s135_s9, 4  ;;  %p88_p0 = scmp.ne.s32.totalorder %s181_s0, %s87_s13  ;;  %s16_s10 = int_to_ptr.vmem [resolvable:$true] %s15_s10 }
   0x3   :  { %p91_p1 = scmp.lt.u32.totalorder %s87_s13, %s181_s0 }
   0x5   :  { %p93_p2 = pnand %p91_p1, %p88_p0 }
   0x7   :  { %96 = shalt.err (!%p93_p2)
}
   0x8   :  { %s97_s18 = scalar_lea.vmem %s16_s10, 1024  ;;  %p102_p4 = scmp.lt.s32.totalorder %s16_s10, %s16_s10 }
   0x9   :  { %p98_p3 = scmp.ne.s32.totalorder %s16_s10, %s97_s18  ;;  %p103_p5 = scmp.lt.s32.totalorder %s97_s18, %s97_s18 }
   0xb   :  { %p104_p6 = por %p103_p5, %p102_p4 }
   0xd   :  { %p105_p7 = pnand %p104_p6, %p98_p3 }
   0xf   :  { %108 = shalt.err (!%p105_p7)
}
  0x10   :  { %18 = dma.hbm_to_vmem [thread:$0]  %s181_s0, 1024, %s16_s10, [#allocation3]  }
  0x11   :  { %131 = dma.done.wait [#allocation3], 1024  }
  0x12   :  { %132 = vsyncadd [#allocation3], 4294966272  ;;  %v136_v0 = vmov 0   ;;  %v24_v1 = vld [vmem:[%s182_s1] sm:$0x3f]  ;;  %v137_v2 = vmov 1  }
  0x13   :  { %85 = vset.pattern.permute.xlu0 %v136_v0  ;;  %v25_v4 = vld [vmem:[#allocation2] sm:$0x3f]  ;;  %v26_v5 = vld [vmem:[#allocation2 + $0x8] sm:$0x3f]  ;;  %v27_v6 = vld [vmem:[#allocation2 + $0x10] sm:$0x3f] }
  0x14   :  { %35 = vperm.xlu0 %85, %v24_v1   ;;  %v28_v7 = vld [vmem:[#allocation2 + $0x18] sm:$0x3f]  ;;  %v29_v8 = vld [vmem:[#allocation2 + $0x20] sm:$0x3f]  ;;  %v30_v9 = vld [vmem:[#allocation2 + $0x28] sm:$0x3f] }
  0x15   :  { %v31_v10 = vld [vmem:[#allocation2 + $0x30] sm:$0x3f]  ;;  %v32_v11 = vld [vmem:[#allocation2 + $0x38] sm:$0x3f]  ;;  %s138_s0 = smov [#allocation5]  }
  0x16   :  { %s72_s23 = sshll.u32 %s138_s0, 4  ;;  %s73_s23 = int_to_ptr.vmem [resolvable:$true] %s72_s23 }
  0x17   :  { %s109_s1 = scalar_lea.vmem %s73_s23, 1024  ;;  %p114_p9 = scmp.lt.s32.totalorder %s73_s23, %s73_s23 }
  0x18   :  { %86 = vset.pattern.permute.xlu0 %v137_v2  ;;  %p110_p8 = scmp.ne.s32.totalorder %s73_s23, %s109_s1  ;;  %p115_p10 = scmp.lt.s32.totalorder %s109_s1, %s109_s1 }
  0x19   :  { %47 = vperm.xlu0 %86, %v24_v1  }
  0x1a   :  { %p116_p11 = por %p115_p10, %p114_p9 }
  0x1c   :  { %p117_p12 = pnand %p116_p11, %p110_p8 }
  0x93   :  { %v36_v3 = vpop.permute.xlu0 %35 }
  0x94   :  { %v38_v12 = vmul.f32 %v36_v3, %v25_v4  ;;  %v39_v13 = vmul.f32 %v36_v3, %v26_v5  ;;  %v40_v14 = vmul.f32 %v36_v3, %v27_v6  ;;  %v41_v15 = vmul.f32 %v36_v3, %v28_v7 }
  0x95   :  { %v42_v16 = vmul.f32 %v36_v3, %v29_v8  ;;  %v43_v17 = vmul.f32 %v36_v3, %v30_v9  ;;  %v44_v18 = vmul.f32 %v36_v3, %v31_v10  ;;  %v45_v19 = vmul.f32 %v36_v3, %v32_v11 }
  0x98   :  { %v48_v20 = vpop.permute.xlu0 %47 }
  0x99   :  { %v50_v21 = vadd.f32 %v48_v20, %v38_v12  ;;  %v51_v22 = vadd.f32 %v48_v20, %v39_v13  ;;  %v52_v23 = vadd.f32 %v48_v20, %v40_v14  ;;  %v53_v24 = vadd.f32 %v48_v20, %v41_v15 }
  0x9a   :  { %v54_v25 = vadd.f32 %v48_v20, %v42_v16  ;;  %v55_v26 = vadd.f32 %v48_v20, %v43_v17  ;;  %v56_v27 = vadd.f32 %v48_v20, %v44_v18  ;;  %v57_v28 = vadd.f32 %v48_v20, %v45_v19 }
  0x9b   :  { %58 = vst [vmem:[#allocation5] sm:$0x3f] %v50_v21  ;;  %59 = vst [vmem:[#allocation5 + $0x8] sm:$0x3f] %v51_v22 }
  0x9c   :  { %60 = vst [vmem:[#allocation5 + $0x10] sm:$0x3f] %v52_v23  ;;  %61 = vst [vmem:[#allocation5 + $0x18] sm:$0x3f] %v53_v24 }
  0x9d   :  { %62 = vst [vmem:[#allocation5 + $0x20] sm:$0x3f] %v54_v25  ;;  %63 = vst [vmem:[#allocation5 + $0x28] sm:$0x3f] %v55_v26 }
  0x9e   :  { %64 = vst [vmem:[#allocation5 + $0x30] sm:$0x3f] %v56_v27  ;;  %65 = vst [vmem:[#allocation5 + $0x38] sm:$0x3f] %v57_v28 }
  0x9f   :  { %120 = shalt.err (!%p117_p12)
}
  0xa0   :  { %s121_s26 = scalar_lea.hbm %s183_s2, 1024 }
  0xa1   :  { %p122_p13 = scmp.ne.s32.totalorder %s183_s2, %s121_s26  ;;  %p125_p0 = scmp.lt.u32.totalorder %s121_s26, %s183_s2 }
  0xa3   :  { %p127_p1 = pnand %p125_p0, %p122_p13 }
  0xa5   :  { %130 = shalt.err (!%p127_p1)
}
  0xa6   :  { %75 = dma.vmem_to_hbm [thread:$0]  %s73_s23, 1024, %s183_s2, [#allocation4]  }
  0xa7   :  { %133 = dma.done.wait [#allocation4], 1024  }
  0xa8   :  { %134 = vsyncadd [#allocation4], 4294966272 }
  0xa9   :  { %79 = vsyncpa [#allocation3], 1 }
  0xaa   :  { %80 = vsyncpa [#allocation4], 1 }

</bundles_post_ra>
